<compile_context>
chip_gen: v6e
topology: v6e:2x2x1
jax: 0.10.0
libtpu: 0.0.40
codegen_flags: <defaults>
</compile_context>

<pallas_src>
import jax
import jax.numpy as jnp
from jax.experimental import pallas as pl
from jax.experimental.pallas import tpu as pltpu


def _round_up(v, m):
    return (v + m - 1) // m * m


def _vmem_capacity_bytes():
    """Physical VMEM of the current TPU generation (conservative fallback)."""
    try:
        info = pltpu.get_tpu_info()
        for attr in ("vmem_capacity_bytes", "vmem_size_bytes", "vmem_bytes"):
            v = getattr(info, attr, None)
            if v:
                return int(v)
    except Exception:
        pass
    return 64 << 20  # v7x physical VMEM; safe lower bound for v5e/v6e too


def _padded_tile_bytes(shape, dtype):
    """VMEM bytes of one tile after (sublane, lane) padding."""
    itemsize = jnp.dtype(dtype).itemsize
    sublane = {4: 8, 2: 16, 1: 32}.get(itemsize, 8)
    if len(shape) == 1:
        return _round_up(int(shape[0]), 128) * itemsize * sublane
    lead = 1
    for d in shape[:-2]:
        lead *= int(d)
    return (lead * _round_up(int(shape[-2]), sublane)
            * _round_up(int(shape[-1]), 128) * itemsize)


def _encoder_kernel(x_ref, adj_ref, wproj_ref, w2_ref, l3w_ref, bias_ref, z_ref):
    f32 = jnp.float32
    h1_dim, h2_dim = w2_ref.shape              # static

    x = x_ref[...]                              # (N, F)   bf16
    adj = adj_ref[...]                          # (N, N)   f32 (applied twice -> keep precision)
    bias = bias_ref[...]                        # (2, 128) f32; row0 = lin1.b, row1 = lin3.b

    # Fused x projection: [x@W_gc1 | x@W_gc3 | x@lin1.W^T]  -> (N, H1+H2+H1) f32
    xp = jnp.dot(x, wproj_ref[...], preferred_element_type=f32)

    # One adj pass for the two GCN branches sharing LHS x:
    #   relu(adj @ [s1 | s3]) = [relu(adj@s1) | relu(adj@s3)] = [h1 | hg2]
    prop = jnp.maximum(
        jnp.dot(adj, xp[:, : h1_dim + h2_dim], preferred_element_type=f32), 0.0)
    h1 = prop[:, :h1_dim]
    hg2 = prop[:, h1_dim: h1_dim + h2_dim]

    # gc2: hg1 = relu(adj @ (h1 @ W_gc2))
    s2 = jnp.dot(h1, w2_ref[...], preferred_element_type=f32)
    hg1 = jnp.maximum(jnp.dot(adj, s2, preferred_element_type=f32), 0.0)

    # lin1 + ReLU (dropout is identity in eval mode)
    hl = jnp.maximum(xp[:, h1_dim + h2_dim:] + bias[0:1, :h1_dim], 0.0)

    # lin3 without the 96-lane concat: three K=H2 dots summed in f32.
    z = jnp.dot(hg1, l3w_ref[0], preferred_element_type=f32)
    z = z + jnp.dot(hg2, l3w_ref[1], preferred_element_type=f32)
    z = z + jnp.dot(hl, l3w_ref[2], preferred_element_type=f32)
    z_ref[...] = (z + bias[1:2, :]).astype(z_ref.dtype)


def graph_vae_encoder_ae(x, adj, packed, *, out_dtype=jnp.float32):
    """Fused forward of GraphVAEncoder (type='AE').

    x:   (N, F) or (B, N, F);  adj: (N, N) or (B, N, N).
    Returns (z, z, None) with z of shape (..., hidden_dim2).
    """
    single = x.ndim == 2
    if single:
        x = x[None]
        adj = adj[None]
    B, N, feat = x.shape
    assert adj.shape == (B, N, N), (adj.shape, (B, N, N))

    h1_dim, h2_dim = packed["w2"].shape
    assert h1_dim == h2_dim, "module only type-checks when hidden_dim1 == hidden_dim2"
    out_pad = packed["lin3_w"].shape[-1]

    x_bf = x.astype(jnp.bfloat16)
    adj_f32 = adj.astype(jnp.float32)
    weights = (packed["w_proj"], packed["w2"], packed["lin3_w"], packed["bias"])

    # --- generation-aware VMEM budget ---------------------------------------
    blk_bytes = (_padded_tile_bytes((N, feat), x_bf.dtype)
                 + _padded_tile_bytes((N, N), adj_f32.dtype)
                 + _padded_tile_bytes((N, out_pad), out_dtype))
    weight_bytes = sum(_padded_tile_bytes(w.shape, w.dtype) for w in weights)
    # intermediates the compiler keeps live per graph (xp, prop, s2, hg1, hl, z), f32
    inter_bytes = _round_up(N, 8) * (3 * h1_dim + 3 * h2_dim + out_pad) * 4
    need = 2 * blk_bytes + 2 * weight_bytes + inter_bytes + (2 << 20)

    budget = int(0.85 * _vmem_capacity_bytes())
    if need > budget:
        # TODO(synk): row-block two-pass path for very large graphs (pass 1:
        # x-projection + prop=relu(adj@[s1|s3]) + s2 streamed over >=256-row adj
        # tiles; pass 2: row grid for hg1 + lin3) so (N,N) adjacencies that no
        # longer fit VMEM (N ~ 4-5k on v7x) still run; not needed at test sizes.
        raise NotImplementedError(
            f"per-graph footprint {need / 2**20:.1f} MiB exceeds VMEM budget "
            f"{budget / 2**20:.1f} MiB; row-blocked path not implemented")
    vmem_limit = int(min(max(need, 32 << 20), budget))

    # --- cost hint for the XLA scheduler -------------------------------------
    flops_per_graph = 2 * N * (
        feat * (2 * h1_dim + h2_dim)       # fused x projection
        + N * (h1_dim + h2_dim)            # adj @ [s1|s3]
        + h1_dim * h2_dim                  # h1 @ W_gc2
        + N * h2_dim                       # adj @ s2
        + 3 * h2_dim * out_pad)            # lin3 (three split dots)
    in_bytes = (int(x_bf.size) * 2 + int(adj_f32.size) * 4
                + sum(int(w.size) * w.dtype.itemsize for w in weights))
    out_bytes = B * N * out_pad * jnp.dtype(out_dtype).itemsize
    cost = pl.CostEstimate(flops=int(B * flops_per_graph), transcendentals=0,
                           bytes_accessed=int(in_bytes + out_bytes))

    # --- grid over graphs; weights shared across all grid steps --------------
    def graph_block(shape):
        return pl.BlockSpec((pl.Squeezed(),) + shape, lambda b: (b, 0, 0))

    def shared_block(arr):
        zeros = (0,) * arr.ndim
        return pl.BlockSpec(arr.shape, lambda b: zeros)

    z_pad = pl.pallas_call(
        _encoder_kernel,
        out_shape=jax.ShapeDtypeStruct((B, N, out_pad), out_dtype),
        grid=(B,),
        in_specs=[
            graph_block((N, feat)),            # x        (per graph)
            graph_block((N, N)),               # adj      (per graph)
            shared_block(packed["w_proj"]),    # packed x projection  (bf16)
            shared_block(packed["w2"]),        # W_gc2                (f32)
            shared_block(packed["lin3_w"]),    # lin3 split stack     (f32)
            shared_block(packed["bias"]),      # lin1.b / lin3.b      (f32)
        ],
        out_specs=graph_block((N, out_pad)),
        compiler_params=pltpu.CompilerParams(
            dimension_semantics=("parallel",),   # graphs independent -> both v7x TCs
            vmem_limit_bytes=vmem_limit),
        cost_estimate=cost,
    )(x_bf, adj_f32, *weights)

    # Drop the 128-lane padding.  (Consumers that keep working on the padded
    # slab, or pass out_dtype=jnp.bfloat16, avoid this extra HBM round trip.)
    z = z_pad[..., :h2_dim]
    if single:
        z = z[0]
    return z, z, None


def pack_params(params):
    """Pack/cast module parameters into the fused-kernel layout (done once)."""
    h1_dim = params["w1"].shape[1]
    h2_dim = params["w2"].shape[1]
    out_pad = _round_up(h2_dim, 128)

    # Column-packed x projection: [W_gc1 | W_gc3 | lin1.W^T]  -> one bf16 MXU pass.
    w_proj = jnp.concatenate(
        [params["w1"], params["w3"], params["lin1_w_t"]], axis=1
    ).astype(jnp.bfloat16)

    # lin3.W^T split row-wise into the three K=H2 operands (concat-free lin3),
    # each zero-padded to 128 output lanes for an unmasked lane-dense store.
    l3 = (jnp.zeros((3 * h2_dim, out_pad), jnp.float32)
          .at[:, :h2_dim].set(params["lin3_w_t"]))
    lin3_w = l3.reshape(3, h2_dim, out_pad)          # kept f32 (consumed by f32 dots)

    # Both biases packed into one f32 (2, out_pad) array.
    bias = (jnp.zeros((2, out_pad), jnp.float32)
            .at[0, :h1_dim].set(params["lin1_b"])
            .at[1, :h2_dim].set(params["lin3_b"]))

    return {
        "w_proj": w_proj,
        "w2": params["w2"].astype(jnp.float32),
        "lin3_w": lin3_w,
        "bias": bias,
    }


def init_params(key, input_feat_dim, hidden_dim1, hidden_dim2):
    """Deterministic synthetic init matching the module's parameter shapes."""
    ks = jax.random.split(key, 8)

    def xavier(k, shape):
        fan_in, fan_out = shape
        bound = (6.0 / (fan_in + fan_out)) ** 0.5
        return jax.random.uniform(k, shape, jnp.float32, -bound, bound)

    # GCN weights (in_features, out_features)
    w1 = xavier(ks[0], (input_feat_dim, hidden_dim1))
    w2 = xavier(ks[1], (hidden_dim1, hidden_dim2))
    w3 = xavier(ks[2], (input_feat_dim, hidden_dim2))

    # nn.Linear params (PyTorch stores W as (out, in); we keep W^T).
    lin1_w_t = xavier(ks[3], (input_feat_dim, hidden_dim1))
    lin1_b = jax.random.uniform(ks[4], (hidden_dim1,), jnp.float32, -0.1, 0.1)
    lin3_w_t = xavier(ks[5], (hidden_dim2 * 3, hidden_dim2))
    lin3_b = jax.random.uniform(ks[6], (hidden_dim2,), jnp.float32, -0.1, 0.1)

    return {
        "w1": w1, "w2": w2, "w3": w3,
        "lin1_w_t": lin1_w_t, "lin1_b": lin1_b,
        "lin3_w_t": lin3_w_t, "lin3_b": lin3_b,
    }
    # TODO(synk): lin2, weight1-3, convs (GCNConv stack) and ln (LayerNorm) exist
    # in __init__ but are unused by forward(type='AE'), so they are not created.


def _reference(x, adj, p):
    """Pure-JAX f32 reference matching the PyTorch module (eval mode), one graph."""
    relu = lambda v: jnp.maximum(v, 0.0)
    h1 = relu(adj @ (x @ p["w1"]))
    hg1 = relu(adj @ (h1 @ p["w2"]))
    hg2 = relu(adj @ (x @ p["w3"]))
    hl = relu(x @ p["lin1_w_t"] + p["lin1_b"])
    cat = jnp.concatenate([hg1, hg2, hl], axis=1)
    return cat @ p["lin3_w_t"] + p["lin3_b"]


if __name__ == "__main__":
    key = jax.random.PRNGKey(0)
    k_x, k_adj, k_p = jax.random.split(key, 3)

    B = 2                  # graphs per pallas_call (batched grid axis)
    N = 64                 # nodes per graph
    input_feat_dim = 16
    hidden_dim1 = 32
    hidden_dim2 = 32       # must equal hidden_dim1 (lin3 expects 3*hidden_dim2 inputs)

    x = jax.random.normal(k_x, (B, N, input_feat_dim), jnp.float32)
    # symmetric row-normalized dense adjacency per graph
    a = jax.random.uniform(k_adj, (B, N, N), jnp.float32)
    adj = (a + jnp.swapaxes(a, -1, -2)) * 0.5
    adj = adj / jnp.sum(adj, axis=-1, keepdims=True)

    params = init_params(k_p, input_feat_dim, hidden_dim1, hidden_dim2)
    packed = pack_params(params)

    z, z2, logvar = graph_vae_encoder_ae(x, adj, packed)
    jax.block_until_ready(z)

    ref = jax.vmap(lambda xg, ag: _reference(xg, ag, params))(x, adj)
    assert z.shape == ref.shape, (z.shape, ref.shape)
    # Only x / W_proj are bf16 MXU operands (f32 accumulation); adj and everything
    # downstream stay f32, so the tolerance is tight.
    assert jnp.allclose(z, ref, atol=2e-2, rtol=2e-2), "mismatch vs JAX reference"
    assert logvar is None and (z is z2 or jnp.array_equal(z, z2))

    # Single-graph (B=1) path goes through the same kernel.
    z1, _, _ = graph_vae_encoder_ae(x[0], adj[0], packed)
    jax.block_until_ready(z1)
    assert z1.shape == ref[0].shape
    assert jnp.allclose(z1, ref[0], atol=2e-2, rtol=2e-2), "single-graph mismatch"

    print("KERNEL_OK")
</pallas_src>

<mosaic_0001>
module attributes {stable_mosaic.version = 11 : i64} {
  func.func @_encoder_kernel(%arg0: i32, %arg1: memref<1x64x16xbf16, #tpu.memory_space<vmem>>, %arg2: memref<1x64x64xf32, #tpu.memory_space<vmem>>, %arg3: memref<16x96xbf16, #tpu.memory_space<vmem>>, %arg4: memref<32x32xf32, #tpu.memory_space<vmem>>, %arg5: memref<3x32x128xf32, #tpu.memory_space<vmem>>, %arg6: memref<2x128xf32, #tpu.memory_space<vmem>>, %arg7: memref<1x64x128xf32, #tpu.memory_space<vmem>>) attributes {dimension_semantics = [#tpu.dimension_semantics<parallel>], iteration_bounds = array<i64: 2>, scalar_prefetch = 0 : i64, scratch_operands = 0 : i64, tpu.core_type = #tpu.core_type<tc>, window_params = [{transform_indices = @transform_0, window_bounds = array<i64: 1, 64, 16>}, {transform_indices = @transform_1, window_bounds = array<i64: 1, 64, 64>}, {pipeline_mode = #tpu.pipeline_mode<synchronous>, transform_indices = @transform_2, window_bounds = array<i64: 16, 96>}, {pipeline_mode = #tpu.pipeline_mode<synchronous>, transform_indices = @transform_3, window_bounds = array<i64: 32, 32>}, {pipeline_mode = #tpu.pipeline_mode<synchronous>, transform_indices = @transform_4, window_bounds = array<i64: 3, 32, 128>}, {pipeline_mode = #tpu.pipeline_mode<synchronous>, transform_indices = @transform_5, window_bounds = array<i64: 2, 128>}, {transform_indices = @transform_6, window_bounds = array<i64: 1, 64, 128>}]} {
    %c0 = arith.constant 0 : index
    %c0_0 = arith.constant 0 : index
    %c0_1 = arith.constant 0 : index
    %0 = vector.load %arg1[%c0, %c0_0, %c0_1] : memref<1x64x16xbf16, #tpu.memory_space<vmem>>, vector<1x64x16xbf16>
    %1 = vector.shape_cast %0 : vector<1x64x16xbf16> to vector<64x16xbf16>
    %c0_2 = arith.constant 0 : index
    %c0_3 = arith.constant 0 : index
    %c0_4 = arith.constant 0 : index
    %2 = vector.load %arg2[%c0_2, %c0_3, %c0_4] : memref<1x64x64xf32, #tpu.memory_space<vmem>>, vector<1x64x64xf32>
    %3 = vector.shape_cast %2 : vector<1x64x64xf32> to vector<64x64xf32>
    %c0_5 = arith.constant 0 : index
    %c0_6 = arith.constant 0 : index
    %4 = vector.load %arg6[%c0_5, %c0_6] : memref<2x128xf32, #tpu.memory_space<vmem>>, vector<2x128xf32>
    %c0_7 = arith.constant 0 : index
    %c0_8 = arith.constant 0 : index
    %5 = vector.load %arg3[%c0_7, %c0_8] : memref<16x96xbf16, #tpu.memory_space<vmem>>, vector<16x96xbf16>
    %cst = arith.constant dense<0.000000e+00> : vector<64x96xf32>
    %6 = tpu.matmul %1, %5, %cst {dimension_numbers = #tpu.dot_dimension_numbers<[1], [0], [0], [1], [0, 0, 1, 1], [], []>} : vector<64x16xbf16>, vector<16x96xbf16>, vector<64x96xf32> -> vector<64x96xf32>
    %7 = vector.extract_strided_slice %6 {offsets = [0, 0], sizes = [64, 64], strides = [1, 1]} : vector<64x96xf32> to vector<64x64xf32>
    %cst_9 = arith.constant dense<0.000000e+00> : vector<64x64xf32>
    %8 = tpu.matmul %3, %7, %cst_9 {dimension_numbers = #tpu.dot_dimension_numbers<[1], [0], [0], [1], [0, 0, 1, 1], [], []>} : vector<64x64xf32>, vector<64x64xf32>, vector<64x64xf32> -> vector<64x64xf32>
    %cst_10 = arith.constant 0.000000e+00 : f32
    %9 = vector.broadcast %cst_10 : f32 to vector<64x64xf32>
    %10 = arith.maximumf %8, %9 : vector<64x64xf32>
    %11 = vector.extract_strided_slice %10 {offsets = [0, 0], sizes = [64, 32], strides = [1, 1]} : vector<64x64xf32> to vector<64x32xf32>
    %12 = vector.extract_strided_slice %10 {offsets = [0, 32], sizes = [64, 32], strides = [1, 1]} : vector<64x64xf32> to vector<64x32xf32>
    %c0_11 = arith.constant 0 : index
    %c0_12 = arith.constant 0 : index
    %13 = vector.load %arg4[%c0_11, %c0_12] : memref<32x32xf32, #tpu.memory_space<vmem>>, vector<32x32xf32>
    %cst_13 = arith.constant dense<0.000000e+00> : vector<64x32xf32>
    %14 = tpu.matmul %11, %13, %cst_13 {dimension_numbers = #tpu.dot_dimension_numbers<[1], [0], [0], [1], [0, 0, 1, 1], [], []>} : vector<64x32xf32>, vector<32x32xf32>, vector<64x32xf32> -> vector<64x32xf32>
    %cst_14 = arith.constant dense<0.000000e+00> : vector<64x32xf32>
    %15 = tpu.matmul %3, %14, %cst_14 {dimension_numbers = #tpu.dot_dimension_numbers<[1], [0], [0], [1], [0, 0, 1, 1], [], []>} : vector<64x64xf32>, vector<64x32xf32>, vector<64x32xf32> -> vector<64x32xf32>
    %cst_15 = arith.constant 0.000000e+00 : f32
    %16 = vector.broadcast %cst_15 : f32 to vector<64x32xf32>
    %17 = arith.maximumf %15, %16 : vector<64x32xf32>
    %18 = vector.extract_strided_slice %6 {offsets = [0, 64], sizes = [64, 32], strides = [1, 1]} : vector<64x96xf32> to vector<64x32xf32>
    %19 = vector.extract_strided_slice %4 {offsets = [0, 0], sizes = [1, 32], strides = [1, 1]} : vector<2x128xf32> to vector<1x32xf32>
    %20 = vector.broadcast %19 : vector<1x32xf32> to vector<64x32xf32>
    %21 = arith.addf %18, %20 : vector<64x32xf32>
    %cst_16 = arith.constant 0.000000e+00 : f32
    %22 = vector.broadcast %cst_16 : f32 to vector<64x32xf32>
    %23 = arith.maximumf %21, %22 : vector<64x32xf32>
    %c0_17 = arith.constant 0 : index
    %c0_18 = arith.constant 0 : index
    %c0_19 = arith.constant 0 : index
    %24 = vector.load %arg5[%c0_17, %c0_18, %c0_19] : memref<3x32x128xf32, #tpu.memory_space<vmem>>, vector<1x32x128xf32>
    %25 = vector.shape_cast %24 : vector<1x32x128xf32> to vector<32x128xf32>
    %cst_20 = arith.constant dense<0.000000e+00> : vector<64x128xf32>
    %26 = tpu.matmul %17, %25, %cst_20 {dimension_numbers = #tpu.dot_dimension_numbers<[1], [0], [0], [1], [0, 0, 1, 1], [], []>} : vector<64x32xf32>, vector<32x128xf32>, vector<64x128xf32> -> vector<64x128xf32>
    %c1 = arith.constant 1 : index
    %c0_21 = arith.constant 0 : index
    %c0_22 = arith.constant 0 : index
    %27 = vector.load %arg5[%c1, %c0_21, %c0_22] : memref<3x32x128xf32, #tpu.memory_space<vmem>>, vector<1x32x128xf32>
    %28 = vector.shape_cast %27 : vector<1x32x128xf32> to vector<32x128xf32>
    %cst_23 = arith.constant dense<0.000000e+00> : vector<64x128xf32>
    %29 = tpu.matmul %12, %28, %cst_23 {dimension_numbers = #tpu.dot_dimension_numbers<[1], [0], [0], [1], [0, 0, 1, 1], [], []>} : vector<64x32xf32>, vector<32x128xf32>, vector<64x128xf32> -> vector<64x128xf32>
    %30 = arith.addf %26, %29 : vector<64x128xf32>
    %c2 = arith.constant 2 : index
    %c0_24 = arith.constant 0 : index
    %c0_25 = arith.constant 0 : index
    %31 = vector.load %arg5[%c2, %c0_24, %c0_25] : memref<3x32x128xf32, #tpu.memory_space<vmem>>, vector<1x32x128xf32>
    %32 = vector.shape_cast %31 : vector<1x32x128xf32> to vector<32x128xf32>
    %cst_26 = arith.constant dense<0.000000e+00> : vector<64x128xf32>
    %33 = tpu.matmul %23, %32, %cst_26 {dimension_numbers = #tpu.dot_dimension_numbers<[1], [0], [0], [1], [0, 0, 1, 1], [], []>} : vector<64x32xf32>, vector<32x128xf32>, vector<64x128xf32> -> vector<64x128xf32>
    %34 = arith.addf %30, %33 : vector<64x128xf32>
    %35 = vector.extract_strided_slice %4 {offsets = [1, 0], sizes = [1, 128], strides = [1, 1]} : vector<2x128xf32> to vector<1x128xf32>
    %36 = vector.broadcast %35 : vector<1x128xf32> to vector<64x128xf32>
    %37 = arith.addf %34, %36 : vector<64x128xf32>
    %c0_27 = arith.constant 0 : index
    %c0_28 = arith.constant 0 : index
    %c0_29 = arith.constant 0 : index
    %38 = vector.load %arg7[%c0_27, %c0_28, %c0_29] : memref<1x64x128xf32, #tpu.memory_space<vmem>>, vector<1x64x128xf32>
    %39 = vector.shape_cast %38 : vector<1x64x128xf32> to vector<64x128xf32>
    %40 = vector.shape_cast %37 : vector<64x128xf32> to vector<1x64x128xf32>
    tpu.vector_store %arg7[%c0_27, %c0_28, %c0_29], %40 {strides = array<i32>} : memref<1x64x128xf32, #tpu.memory_space<vmem>>, vector<1x64x128xf32>,
    return
  }
  func.func @transform_0(%arg0: i32) -> (i32, i32, i32) {
    %c0_i32 = arith.constant 0 : i32
    %c0_i32_0 = arith.constant 0 : i32
    %c0_i32_1 = arith.constant 0 : i32
    return %arg0, %c0_i32, %c0_i32_0 : i32, i32, i32
  }
  func.func @transform_1(%arg0: i32) -> (i32, i32, i32) {
    %c0_i32 = arith.constant 0 : i32
    %c0_i32_0 = arith.constant 0 : i32
    %c0_i32_1 = arith.constant 0 : i32
    return %arg0, %c0_i32, %c0_i32_0 : i32, i32, i32
  }
  func.func @transform_2(%arg0: i32) -> (i32, i32) {
    %c0_i32 = arith.constant 0 : i32
    %c0_i32_0 = arith.constant 0 : i32
    %c0_i32_1 = arith.constant 0 : i32
    return %c0_i32, %c0_i32_0 : i32, i32
  }
  func.func @transform_3(%arg0: i32) -> (i32, i32) {
    %c0_i32 = arith.constant 0 : i32
    %c0_i32_0 = arith.constant 0 : i32
    %c0_i32_1 = arith.constant 0 : i32
    return %c0_i32, %c0_i32_0 : i32, i32
  }
  func.func @transform_4(%arg0: i32) -> (i32, i32, i32) {
    %c0_i32 = arith.constant 0 : i32
    %c0_i32_0 = arith.constant 0 : i32
    %c0_i32_1 = arith.constant 0 : i32
    %c0_i32_2 = arith.constant 0 : i32
    return %c0_i32, %c0_i32_0, %c0_i32_1 : i32, i32, i32
  }
  func.func @transform_5(%arg0: i32) -> (i32, i32) {
    %c0_i32 = arith.constant 0 : i32
    %c0_i32_0 = arith.constant 0 : i32
    %c0_i32_1 = arith.constant 0 : i32
    return %c0_i32, %c0_i32_0 : i32, i32
  }
  func.func @transform_6(%arg0: i32) -> (i32, i32, i32) {
    %c0_i32 = arith.constant 0 : i32
    %c0_i32_0 = arith.constant 0 : i32
    %c0_i32_1 = arith.constant 0 : i32
    return %arg0, %c0_i32, %c0_i32_0 : i32, i32, i32
  }
}

</mosaic_0001>

<bundles_post_ra>
// kernel: tpu_custom_call.1
= control target key start
LH: loop header
LB: loop body
LE: loop exit
PB: predicated region body
PF: predicated region fallthrough
CT: control target
= control target key end

     0   :  { %11 = vsyncpa [#allocation3], 0  ;;  %s2323_s0 = inlined_call_operand.vmem [shape: bf16[2,64,16], index: 0, kind: input, shape index: {}]   ;;  %s2324_s1 = inlined_call_operand.hbm [shape: f32[2,64,64], index: 1, kind: input, shape index: {}]   ;;  %s2325_s2 = inlined_call_operand.vmem [shape: bf16[16,96], index: 2, kind: input, shape index: {}]   ;;  %s2326_s3 = inlined_call_operand.vmem [shape: f32[32,32], index: 3, kind: input, shape index: {}]   ;;  %s2327_s4 = inlined_call_operand.hbm [shape: f32[3,32,128], index: 4, kind: input, shape index: {}]   ;;  %s2328_s5 = inlined_call_operand.vmem [shape: f32[2,128], index: 5, kind: input, shape index: {}]   ;;  %s2329_s6 = inlined_call_operand.hbm [shape: f32[2,64,128], index: 6, kind: output, shape index: {}]  }
   0x1   :  { %13 = vsyncpa [#allocation3 + $0x1], 0 }
   0x2   :  { %14 = vsyncpa [#allocation6], 0 }
   0x3   :  { %15 = vsyncpa [#allocation4], 0 }
   0x4   :  { %17 = vsyncpa [#allocation4 + $0x1], 0  ;;  %s1945_s21 = smov 0   ;;  %s1947_s22 = smov 0  }
   0x5   :  { %s1949_s23 = smov 0   ;;  %s1951_s24 = smov 0  }
   0x6 LB: > { %s1966_s25 = sadd.s32 4294967295, %s1899_s24   ;;  %s1400_s26 = sadd.s32 4294967294, %s1899_s24   ;;  %s1899_s24 = sphi %s1951_s24, %s2355_s24   ;;  %s1895_s23 = sphi %s1949_s23, %s2354_s23   ;;  %s1891_s22 = sphi %s1947_s22, %s2353_s22   ;;  %s1887_s21 = sphi %s1945_s21, %s2352_s21  }
   0x7   : > { %p69_p0 = scmp.ne.s32.totalorder %s1891_s22, %s1887_s21  ;;  %p2330_p1 = scmp.eq.s32.totalorder %s1966_s25, 0 }
   0x8   : > { %p183_p3 = scmp.eq.s32.totalorder %s1400_s26, 1  ;;  %p1401_p5 = scmp.ge.s32.totalorder %s1899_s24, 1 }
   0x9   : > { %p1975_p4 = por %p2330_p1, %p69_p0  ;;  %p190_p7 = scmp.lt.s32.totalorder %s1899_s24, 3 }
   0xa   : > { %p1980_p6 = por %p183_p3, %p69_p0  ;;  %s1901_s30 = smov [#allocation5]  }
   0xb   : > { %s2336_s27 = scalar_select %p1975_p4, 1, 0 }
   0xc   : > { %s2337_s28 = scalar_select %p1980_p6, 1, 0 }
   0xd   : > { %p1985_p8 = pnand %p1401_p5, %p190_p7  ;;  %s208_s7 = sshll.u32 %s1901_s30, 4  ;;  %s209_s7 = int_to_ptr.vmem [resolvable:$true] %s208_s7 }
   0xe   : > { %s1999_s9 = sadd.s32 1, %s1899_s24   ;;  %s56_s10 = sadd.s32 1, %s1895_s23 }
   0xf   : > { %s2338_s29 = scalar_select %p1985_p8, 1, 0 }
  0x10   : > { %p1717_p9 = pneg %p1985_p8  ;;  %s53_s11 = ssub.s32 %s1899_s24, %s1999_s9 }
  0x11   : > { %s1788_s12 = scalar_lea.vmem %s209_s7, 1536  ;;  %p1796_p5 = scmp.lt.s32.totalorder %s209_s7, %s209_s7 }
  0x12   : > { %p1994_p11 = pnand %p1717_p9, %p2330_p1  ;;  %p1789_p13 = scmp.ne.s32.totalorder %s209_s7, %s1788_s12 }
  0x13   : > { %p1797_p7 = scmp.lt.s32.totalorder %s1788_s12, %s1788_s12 }
  0x14   : > { %p1779_p12 = pneg %p1994_p11 }
  0x15   : > { %p1798_p10 = por %p1797_p7, %p1796_p5 }
  0x16   : > { %p1791_p0 = pnand %p1789_p13, %p1779_p12 }
  0x18   : > { %p1792_p3 = pneg %p1791_p0 }
  0x1a   : > { %p1799_p2 = pnand %p1798_p10, %p1792_p3 }
  0x1c   : > { %1802 = shalt.err (!%p1799_p2)
}
  0x1d   : > { %s2331_s13 = smov 128   ;;  %s2332_s14 = smov 8  }
  0x1e   : > { %1720 = dma.hbm_to_vmem [thread:$0]  (!%p1994_p11), %s2327_s4, 1536, %s209_s7, [#allocation6], %s2331_s13, %s2331_s13, %s2332_s14  }
  0x1f   : > { %p54_p2 = scmp.eq.s32.totalorder %s53_s11, 0  ;;  %p63_p9 = scmp.ne.s32.totalorder %s1895_s23, %s1891_s22 }
  0x20   : > { %p64_p10 = scmp.eq.s32.totalorder %s1899_s24, 0  ;;  %p1730_p12 = scmp.lt.s32.totalorder %s1899_s24, 2 }
  0x21   : > { %s2019_s17 = scalar_select %p54_p2, %s1895_s23, %s56_s10  }
  0x22   : > { %p65_p13 = por %p64_p10, %p63_p9  ;;  %p2340_p0 = scmp.eq.s32.totalorder %s1966_s25, 1 }
  0x23   : > { %s233_s19 = sand.u32 1, %s1895_s23   ;;  %s1475_s20 = sshll.u32 %s1899_s24, 10 }
  0x24   : > { %p2023_p3 = por %p2340_p0, %p63_p9  ;;  %s1404_s26 = sshll.u32 %s233_s19, 6 }
  0x25   : > { %s2032_s12 = scalar_lea.hbm %s2324_s1, %s1475_s20  ;;  %s237_s7 = scalar_lea.vmem [#allocation2], %s1404_s26 }
  0x26   : > { %s2341_s18 = scalar_select %p2023_p3, 1, 0 }
  0x27   : > { %s244_s10 = sshll.u32 %s237_s7, 4  ;;  %p2034_p11 = pnand %p1730_p12, %p65_p13  ;;  %s2038_s10 = int_to_ptr.vmem [resolvable:$true] %s244_s10 }
  0x28   : > { %s2040_s15 = scalar_lea.sflag [#allocation3], %s233_s19  ;;  %s1803_s16 = scalar_lea.hbm %s2032_s12, 1024 }
  0x29   : > { %p1804_p5 = scmp.ne.s32.totalorder %s2032_s12, %s1803_s16  ;;  %p1805_p7 = pneg %p2034_p11 }
  0x2a   : > { %s1808_s26 = scalar_lea.hbm %s2324_s1, 2048  ;;  %p1809_p10 = scmp.lt.s32.totalorder %s2032_s12, %s2324_s1 }
  0x2b   : > { %p1806_p2 = pnand %p1805_p7, %p1804_p5  ;;  %p1810_p12 = scmp.lt.s32.totalorder %s1808_s26, %s1803_s16 }
  0x2d   : > { %p1807_p9 = pneg %p1806_p2  ;;  %p1811_p13 = por %p1810_p12, %p1809_p10 }
  0x2f   : > { %p1812_p0 = pnand %p1811_p13, %p1807_p9 }
  0x31   : > { %1815 = shalt.err (!%p1812_p0)
}
  0x32   : > { %s1816_s19 = scalar_lea.vmem %s2038_s10, 1024  ;;  %s1904_s13 = smov [#allocation2]  }
  0x33   : > { %p1817_p1 = scmp.ne.s32.totalorder %s2038_s10, %s1816_s19  ;;  %s1821_s14 = sshll.u32 %s1904_s13, 4  ;;  %s1822_s14 = int_to_ptr.vmem [resolvable:$false] %s1821_s14 }
  0x34   : > { %s1823_s20 = scalar_lea.vmem %s1822_s14, 2048  ;;  %p1824_p2 = scmp.lt.s32.totalorder %s2038_s10, %s1822_s14 }
  0x35   : > { %p1819_p6 = pnand %p1817_p1, %p1805_p7  ;;  %p1825_p3 = scmp.lt.s32.totalorder %s1823_s20, %s1816_s19 }
  0x37   : > { %p1820_p5 = pneg %p1819_p6  ;;  %p1826_p4 = por %p1825_p3, %p1824_p2 }
  0x39   : > { %p1827_p8 = pnand %p1826_p4, %p1820_p5 }
  0x3b   : > { %1830 = shalt.err (!%p1827_p8)
}
  0x3c   : > { %s2343_s16 = smov 8   ;;  %s2344_s30 = smov 128  }
  0x3d   : > { %1724 = dma.hbm_to_vmem [thread:$0]  (!%p2034_p11), %s2032_s12, 1024, %s2038_s10, %s2040_s15, %s2344_s30, %s2344_s30, %s2343_s16  }
  0x3e   : > { %p2345_p1 = scmp.ne.s32.totalorder %s2338_s29, 0 }
  0x3f   : > { %s2067_s13 = sand.u32 (!%p2345_p1), 1, %s1891_s22   ;;  %p2346_p4 = scmp.ne.s32.totalorder (!%p2345_p1), %s2336_s27, 0 }
  0x40   : > { %256 = sbr.rel (%p2345_p1) target bundleno = 1147 (0x47b), region = 44  ;;  %s1408_s14 = sshll.u32 (!%p2345_p1), %s2067_s13, 6 }
  0x41   : > { %s259_s26 = scalar_lea.sflag (!%p2345_p1), [#allocation3], %s2067_s13  ;;  %s2073_s11 = scalar_lea.vmem (!%p2345_p1), [#allocation2], %s1408_s14 }
  0x45   : > { %1874 = dma.done.wait (%p2346_p4), %s259_s26, 1024  }
  0x46   : > { %1876 = vsyncadd (%p2346_p4), %s259_s26, 4294966272  ;;  %p2347_p6 = scmp.eq.s32.totalorder %s1966_s25, 0 }
  0x48   : > { %1878 = dma.done.wait (%p2347_p6), [#allocation6], 1536   ;;  %p2348_p8 = pmov %p2347_p6 }
  0x49   : > { %p300_p3 = scmp.lt.s32.totalorder %s1966_s25, 1  ;;  %v814_v0 = vlaneseq  ;;  %v1772_v2 = vld [vmem:[%s2325_s2] sm:$0xff]   ;;  %vm351_vm0 = vcmask 130048   ;;  %s1905_s16 = smov 64   ;;  %vm429_vm1 = vcmask 523264   ;;  %v570_v13 = vld [vmem:[%s2326_s3 + $0x18] sm:$0xff] }
  0x4a   : > { %1880 = vsyncadd (%p2348_p8), [#allocation6], 4294965760  ;;  %1563 = vmatprep.subr.bf16.mxu0 %v1772_v2  ;;  %v322_v8 = vld [vmem:[%s2328_s5] sm:$0x3]  ;;  %v569_v14 = vld [vmem:[%s2326_s3 + $0x10] sm:$0xff]  ;;  %vm571_vm2 = vcmask 261120  }
  0x4b   : > { %s301_s29 = scalar_select %p300_p3, %s1966_s25, 1  ;;  %v815_v1 = vshrl.u32 %v814_v0, 7  ;;  %1564 = vmatpush3.bf16.msra.mxu0 %v1772_v2  ;;  %v314_v12 = vld [vmem:[%s2073_s11] sm:$0xff]  ;;  %v568_v15 = vld [vmem:[%s2326_s3 + $0x8] sm:$0xff]  ;;  %v2147_v25 = vld [vmem:[%s2073_s11 + $0x10] sm:$0xff] }
  0x4c   : > { %1589 = vmatprep.mubr.msk.f32.mxu1 %vm429_vm1, %v314_v12  ;;  %1601 = vmatprep.subr.mxu0 %v570_v13  ;;  %v2143_v24 = vld [vmem:[%s2073_s11 + $0x8] sm:$0xff]  ;;  %v2155_v26 = vld [vmem:[%s2073_s11 + $0x18] sm:$0xff]  ;;  %v2158_v27 = vld [vmem:[%s2073_s11 + $0x20] sm:$0xff]  ;;  %s2256_s27 = scalar_lea.vmem [#allocation7], %s1408_s14  ;;  %s1477_s14 = sshll.u32 %s1966_s25, 10 }
  0x4d   : > { %s1476_s12 = sshll.u32 %s301_s29, 5  ;;  %v816_v4 = vsub.s32 0, %v815_v1  ;;  %v1273_v6 = vsub.s32 1, %v815_v1  ;;  %v2165_v28 = vld [vmem:[%s2073_s11 + $0x28] sm:$0xff]  ;;  %v2168_v29 = vld [vmem:[%s2073_s11 + $0x30] sm:$0xff]  ;;  %v2175_v30 = vld [vmem:[%s2073_s11 + $0x38] sm:$0xff]  ;;  %s2275_s30 = scalar_lea.hbm %s2329_s6, %s1477_s14 }
  0x4e   : > { %s304_s8 = scalar_lea.vmem %s2323_s0, %s1476_s12  ;;  %v567_v31 = vld [vmem:[%s2326_s3] sm:$0xff]  ;;  %v846_v32 = vld [vmem:[#allocation5 + $0x38] sm:$0xff]  ;;  %s1906_s11 = smov 96   ;;  %v845_v38 = vld [vmem:[#allocation5 + $0x30] sm:$0xff] }
  0x4f   : > { %v1773_v3 = vld [vmem:[%s304_s8] sm:$0xff]   ;;  %v1774_v5 = vld [vmem:[%s304_s8 + $0x8] sm:$0xff]   ;;  %v1775_v7 = vld [vmem:[%s304_s8 + $0x10] sm:$0xff]   ;;  %v817_v9 = vrot.slane %v322_v8, %v816_v4  ;;  %v2096_v10 = vrot.slane %v322_v8, %v1273_v6  ;;  %s1305_s19 = sshll.u32 %s2256_s27, 4  ;;  %s1292_s25 = scalar_lea.sflag [#allocation4], %s2067_s13  ;;  %s2277_s19 = int_to_ptr.vmem [resolvable:$true] %s1305_s19 }
  0x50   : > { %1565 = vmatprep.mubr.msk.bf16.mxu0 %vm351_vm0, %v1773_v3  ;;  %v1776_v11 = vld [vmem:[%s304_s8 + $0x18] sm:$0xff]   ;;  %v844_v43 = vld [vmem:[#allocation5 + $0x28] sm:$0xff]  ;;  %v843_v47 = vld [vmem:[#allocation5 + $0x20] sm:$0xff]  ;;  %s1831_s26 = scalar_lea.vmem %s2277_s19, 1024  ;;  %p2349_p7 = scmp.ne.s32.totalorder %s2341_s18, 0 }
  0x51   : > { %1566 = vmatmul.mubr.msk.bf16.vlgmr.msra.gmra.mxu0 %vm351_vm0, %v1774_v5  ;;  %819 = vrot.lane.b32.xlu0 %v817_v9, %s1905_s16  ;;  %v1117_v55 = vld [vmem:[#allocation5 + $0x58] sm:$0xff]  ;;  %v1116_v8 = vld [vmem:[#allocation5 + $0x50] sm:$0xff]  ;;  %v1115_v9 = vld [vmem:[#allocation5 + $0x48] sm:$0xff]  ;;  %p1832_p11 = scmp.ne.s32.totalorder %s2277_s19, %s1831_s26  ;;  %s1907_s29 = smov [#allocation7]  }
  0x52   : > { %1569 = vmatprep.mubr.msk.bf16.mxu0 %vm351_vm0, %v1775_v7  ;;  %1602 = vmatpush3.msra.mxu0 %v570_v13  ;;  %v1114_v13 = vld [vmem:[#allocation5 + $0x40] sm:$0xff]  ;;  %s1835_s12 = sshll.u32 %s1907_s29, 4  ;;  %s1836_s12 = int_to_ptr.vmem [resolvable:$false] %s1835_s12 }
  0x53   : > { %1603 = vmatprep.subr.mxu0 %v569_v14  ;;  %p1833_p9 = pnand %p1832_p11, %p2349_p7  ;;  %s1837_s10 = scalar_lea.vmem %s1836_s12, 2048 }
  0x54   : > { %1604 = vmatpush3.msra.mxu0 %v569_v14  ;;  %p1838_p12 = scmp.lt.s32.totalorder %s2277_s19, %s1836_s12  ;;  %p1839_p13 = scmp.lt.s32.totalorder %s1837_s10, %s1831_s26 }
  0x55   : > { %1605 = vmatprep.subr.mxu0 %v568_v15  ;;  %p1834_p10 = pneg %p1833_p9 }
  0x56   : > { %1606 = vmatpush3.msra.mxu0 %v568_v15  ;;  %p1840_p0 = por %p1839_p13, %p1838_p12 }
  0x57   : > { %1607 = vmatprep.subr.mxu0 %v567_v31 }
  0x58   : > { %1608 = vmatpush3.msra.mxu0 %v567_v31  ;;  %p1841_p5 = pnand %p1840_p0, %p1834_p10 }
  0x59   : > { %1570 = vmatmul.mubr.msk.bf16.gmra.mxu0 %vm351_vm0, %v1776_v11  ;;  %1649 = vmatprep.subr.mxu0 %v846_v32 }
  0xc3   : > { %v820_v49 = vpop.permute.xlu0 %819 }
 0x111   : > { %v2112_v16 = vpop.f32.mrf.mxu0 }
 0x112   : > { %v824_v56 = vadd.f32 %v2112_v16, %v820_v49 }
 0x113   : > { %v2114_v17 = vpop.f32.mrf.mxu0 }
 0x114   : > { %v822_v51 = vadd.f32 %v820_v49, %v2114_v17  ;;  %v832_v63 = vmax.f32 %v824_v56, 0.0 }
 0x115   : > { %v2116_v18 = vpop.f32.mrf.mxu0 }
 0x116   : > { %v825_v57 = vadd.f32 %v2116_v18, %v820_v49  ;;  %v830_v59 = vmax.f32 %v822_v51, 0.0 }
 0x117   : > { %v2118_v19 = vpop.f32.mrf.mxu0 }
 0x118   : > { %v823_v52 = vadd.f32 %v820_v49, %v2118_v19  ;;  %v833_v62 = vmax.f32 %v825_v57, 0.0 }
 0x119   : > { %v2120_v20 = vpop.f32.mrf.mxu0 }
 0x11a   : > { %v831_v58 = vmax.f32 %v823_v52, 0.0  ;;  %v828_v0 = vadd.f32 %v2120_v20, %v820_v49 }
 0x11b   : > { %v2122_v21 = vpop.f32.mrf.mxu0 }
 0x11c   : > { %v826_v60 = vadd.f32 %v820_v49, %v2122_v21  ;;  %v836_v5 = vmax.f32 %v828_v0, 0.0 }
 0x11d   : > { %v2124_v22 = vpop.f32.mrf.mxu0 }
 0x11e   : > { %1573 = vmatprep.subr.mxu1 %v2124_v22  ;;  %v829_v1 = vadd.f32 %v2124_v22, %v820_v49  ;;  %v834_v3 = vmax.f32 %v826_v60, 0.0 }
 0x11f   : > { %1574 = vmatpush3.msra.mxu1 %v2124_v22  ;;  %v2129_v23 = vpop.f32.mrf.mxu0 }
 0x120   : > { %1575 = vmatprep.subr.mxu1 %v2120_v20  ;;  %v827_v61 = vadd.f32 %v820_v49, %v2129_v23  ;;  %v837_v4 = vmax.f32 %v829_v1, 0.0 }
 0x121   : > { %1576 = vmatpush3.msra.mxu1 %v2120_v20 }
 0x122   : > { %1577 = vmatprep.subr.mxu1 %v2129_v23  ;;  %v835_v2 = vmax.f32 %v827_v61, 0.0 }
 0x123   : > { %1578 = vmatpush3.msra.mxu1 %v2129_v23 }
 0x124   : > { %1579 = vmatprep.subr.mxu1 %v2122_v21 }
 0x125   : > { %1580 = vmatpush3.msra.mxu1 %v2122_v21 }
 0x126   : > { %1581 = vmatprep.subr.mxu1 %v2116_v18 }
 0x127   : > { %1582 = vmatpush3.msra.mxu1 %v2116_v18 }
 0x128   : > { %1583 = vmatprep.subr.mxu1 %v2112_v16 }
 0x129   : > { %1584 = vmatpush3.msra.mxu1 %v2112_v16 }
 0x12a   : > { %1585 = vmatprep.subr.mxu1 %v2118_v19 }
 0x12b   : > { %1586 = vmatpush3.msra.mxu1 %v2118_v19 }
 0x12c   : > { %1587 = vmatprep.subr.mxu1 %v2114_v17 }
 0x12d   : > { %1588 = vmatpush3.msra.mxu1 %v2114_v17 }
 0x12e   : > { %1590 = vmatmul.mubr.msk.f32.vlgmr.msra.gmra.mxu1 %vm429_vm1, %v2143_v24 }
 0x12f   : > { %1592 = vmatprep.mubr.msk.f32.mxu1 %vm429_vm1, %v2147_v25 }
 0x132   : > { %1593 = vmatmul.mubr.msk.f32.gmra.mxu1 %vm429_vm1, %v2155_v26 }
 0x133   : > { %1595 = vmatprep.mubr.msk.f32.mxu1 %vm429_vm1, %v2158_v27 }
 0x136   : > { %1596 = vmatmul.mubr.msk.f32.gmra.mxu1 %vm429_vm1, %v2165_v28 }
 0x137   : > { %1598 = vmatprep.mubr.msk.f32.mxu1 %vm429_vm1, %v2168_v29 }
 0x13a   : > { %1599 = vmatmul.mubr.msk.f32.gmra.mxu1 %vm429_vm1, %v2175_v30 }
 0x13b   : > { %1637 = vmatprep.mubr.msk.f32.mxu1 %vm429_vm1, %v314_v12 }
 0x1ee   : > { %v1591_v33 = vpop.f32.mrf.mxu1 }
 0x1ef   : > { %v560_v34 = vmax.f32 %v1591_v33, 0.0 }
 0x1f0   : > { %v520_v35 = vpop.f32.mrf.mxu1 }
 0x1f1   : > { %v559_v36 = vmax.f32 %v520_v35, 0.0  ;;  %849 = vrot.lane.b32.xlu1 %v560_v34, %s1906_s11 }
 0x1f2   : > { %v1594_v37 = vpop.f32.mrf.mxu1 }
 0x1f3   : > { %847 = vrot.lane.b32.xlu0 %v559_v36, %s1906_s11  ;;  %1609 = vmatprep.mubr.msk.f32.mxu0 %vm571_vm2, %v559_v36  ;;  %v562_v40 = vmax.f32 %v1594_v37, 0.0 }
 0x1f4   : > { %v530_v39 = vpop.f32.mrf.mxu1  ;;  %1610 = vmatmul.mubr.msk.f32.vlgmr.msra.gmra.mxu0 %vm571_vm2, %v560_v34 }
 0x1f5   : > { %v561_v41 = vmax.f32 %v530_v39, 0.0  ;;  %1650 = vmatpush3.msra.mxu0 %v846_v32 }
 0x1f6   : > { %v1597_v42 = vpop.f32.mrf.mxu1  ;;  %1651 = vmatprep.subr.mxu0 %v845_v38 }
 0x1f7   : > { %853 = vrot.lane.b32.xlu0 %v562_v40, %s1906_s11  ;;  %851 = vrot.lane.b32.xlu1 %v561_v41, %s1906_s11  ;;  %v564_v45 = vmax.f32 %v1597_v42, 0.0  ;;  %v840_v42 = vld [vmem:[#allocation5 + $0x10] sm:$0xff] }
 0x1f8   : > { %1612 = vmatprep.mubr.msk.f32.mxu0 %vm571_vm2, %v561_v41  ;;  %v540_v44 = vpop.f32.mrf.mxu1  ;;  %1652 = vmatpush3.msra.mxu0 %v845_v38  ;;  %v841_v41 = vld [vmem:[#allocation5 + $0x18] sm:$0xff] }
 0x1f9   : > { %v563_v46 = vmax.f32 %v540_v44, 0.0  ;;  %1613 = vmatmul.mubr.msk.f32.gmra.mxu0 %vm571_vm2, %v562_v40  ;;  %1653 = vmatprep.subr.mxu0 %v844_v43 }
 0x1fa   : > { %v1600_v48 = vpop.f32.mrf.mxu1  ;;  %1654 = vmatpush3.msra.mxu0 %v844_v43  ;;  %v839_v43 = vld [vmem:[#allocation5 + $0x8] sm:$0xff] }
 0x1fb   : > { %857 = vrot.lane.b32.xlu0 %v564_v45, %s1906_s11  ;;  %855 = vrot.lane.b32.xlu1 %v563_v46, %s1906_s11  ;;  %v566_v53 = vmax.f32 %v1600_v48, 0.0 }
 0x1fc   : > { %1615 = vmatprep.mubr.msk.f32.mxu0 %vm571_vm2, %v563_v46  ;;  %v550_v50 = vpop.f32.mrf.mxu1  ;;  %1655 = vmatprep.subr.mxu0 %v843_v47 }
 0x1fd   : > { %v565_v54 = vmax.f32 %v550_v50, 0.0  ;;  %1616 = vmatmul.mubr.msk.f32.gmra.mxu0 %vm571_vm2, %v564_v45 }
 0x1fe   : > { %1656 = vmatpush3.msra.mxu0 %v843_v47 }
 0x1ff   : > { %861 = vrot.lane.b32.xlu0 %v566_v53, %s1906_s11  ;;  %859 = vrot.lane.b32.xlu1 %v565_v54, %s1906_s11 }
 0x200   : > { %1618 = vmatprep.mubr.msk.f32.mxu0 %vm571_vm2, %v565_v54  ;;  %1689 = vmatprep.subr.mxu0 %v1117_v55 }
 0x201   : > { %1619 = vmatmul.mubr.msk.f32.gmra.mxu0 %vm571_vm2, %v566_v53 }
 0x203   : > { %1128 = vrot.lane.b32.xlu0 %v831_v58, %s1905_s16  ;;  %1126 = vrot.lane.b32.xlu1 %v830_v59, %s1905_s16 }
 0x207   : > { %1132 = vrot.lane.b32.xlu0 %v833_v62, %s1905_s16  ;;  %1130 = vrot.lane.b32.xlu1 %v832_v63, %s1905_s16 }
 0x20b   : > { %1136 = vrot.lane.b32.xlu0 %v835_v2, %s1905_s16  ;;  %1134 = vrot.lane.b32.xlu1 %v834_v3, %s1905_s16 }
 0x20f   : > { %1140 = vrot.lane.b32.xlu0 %v837_v4, %s1905_s16  ;;  %1138 = vrot.lane.b32.xlu1 %v836_v5, %s1905_s16 }
 0x263   : > { %v850_v6 = vpop.permute.xlu1 %849 }
 0x265   : > { %v848_v7 = vpop.permute.xlu0 %847 }
 0x266   : > { %1657 = vmatprep.mubr.msk.f32.mxu0 %vm571_vm2, %v848_v7 }
 0x267   : > { %1658 = vmatmul.mubr.msk.f32.vlgmr.msra.gmra.mxu0 %vm571_vm2, %v850_v6 }
 0x268   : > { %1690 = vmatpush3.msra.mxu0 %v1117_v55 }
 0x269   : > { %v854_v11 = vpop.permute.xlu0 %853  ;;  %v852_v12 = vpop.permute.xlu1 %851  ;;  %1691 = vmatprep.subr.mxu0 %v1116_v8 }
 0x26a   : > { %1660 = vmatprep.mubr.msk.f32.mxu0 %vm571_vm2, %v852_v12  ;;  %1692 = vmatpush3.msra.mxu0 %v1116_v8 }
 0x26b   : > { %1661 = vmatmul.mubr.msk.f32.gmra.mxu0 %vm571_vm2, %v854_v11  ;;  %1693 = vmatprep.subr.mxu0 %v1115_v9 }
 0x26c   : > { %1694 = vmatpush3.msra.mxu0 %v1115_v9 }
 0x26d   : > { %v858_v14 = vpop.permute.xlu0 %857  ;;  %v856_v15 = vpop.permute.xlu1 %855  ;;  %1695 = vmatprep.subr.mxu0 %v1114_v13 }
 0x26e   : > { %1663 = vmatprep.mubr.msk.f32.mxu0 %vm571_vm2, %v856_v15  ;;  %1696 = vmatpush3.msra.mxu0 %v1114_v13 }
 0x26f   : > { %1664 = vmatmul.mubr.msk.f32.gmra.mxu0 %vm571_vm2, %v858_v14 }
 0x271   : > { %v862_v16 = vpop.permute.xlu0 %861  ;;  %v860_v17 = vpop.permute.xlu1 %859 }
 0x272   : > { %1666 = vmatprep.mubr.msk.f32.mxu0 %vm571_vm2, %v860_v17 }
 0x273   : > { %1667 = vmatmul.mubr.msk.f32.gmra.mxu0 %vm571_vm2, %v862_v16 }
 0x275   : > { %v1129_v18 = vpop.permute.xlu0 %1128  ;;  %v1127_v19 = vpop.permute.xlu1 %1126 }
 0x276   : > { %1697 = vmatprep.mubr.msk.f32.mxu0 %vm571_vm2, %v1127_v19 }
 0x277   : > { %1698 = vmatmul.mubr.msk.f32.vlgmr.msra.gmra.mxu0 %vm571_vm2, %v1129_v18 }
 0x279   : > { %v1133_v20 = vpop.permute.xlu0 %1132  ;;  %v1131_v21 = vpop.permute.xlu1 %1130 }
 0x27a   : > { %1700 = vmatprep.mubr.msk.f32.mxu0 %vm571_vm2, %v1131_v21 }
 0x27b   : > { %1701 = vmatmul.mubr.msk.f32.gmra.mxu0 %vm571_vm2, %v1133_v20 }
 0x27d   : > { %v1137_v22 = vpop.permute.xlu0 %1136  ;;  %v1135_v23 = vpop.permute.xlu1 %1134 }
 0x27e   : > { %1703 = vmatprep.mubr.msk.f32.mxu0 %vm571_vm2, %v1135_v23 }
 0x27f   : > { %1704 = vmatmul.mubr.msk.f32.gmra.mxu0 %vm571_vm2, %v1137_v22 }
 0x281   : > { %v1141_v31 = vpop.permute.xlu0 %1140  ;;  %v1139_v32 = vpop.permute.xlu1 %1138 }
 0x282   : > { %1706 = vmatprep.mubr.msk.f32.mxu0 %vm571_vm2, %v1139_v32 }
 0x283   : > { %1707 = vmatmul.mubr.msk.f32.gmra.mxu0 %vm571_vm2, %v1141_v31 }
 0x2b4   : > { %v1611_v33 = vpop.f32.mrf.mxu0 }
 0x2b6   : > { %v662_v34 = vpop.f32.mrf.mxu0 }
 0x2b9   : > { %v1614_v35 = vpop.f32.mrf.mxu0 }
 0x2bb   : > { %v672_v36 = vpop.f32.mrf.mxu0 }
 0x2bd   : > { %v1617_v37 = vpop.f32.mrf.mxu0 }
 0x2bf   : > { %v682_v38 = vpop.f32.mrf.mxu0 }
 0x2c1   : > { %v1620_v39 = vpop.f32.mrf.mxu0 }
 0x2c2   : > { %1621 = vmatprep.subr.mxu1 %v1620_v39 }
 0x2c3   : > { %v692_v40 = vpop.f32.mrf.mxu0  ;;  %1622 = vmatpush3.msra.mxu1 %v1620_v39 }
 0x2c4   : > { %1623 = vmatprep.subr.mxu1 %v692_v40 }
 0x2c5   : > { %1624 = vmatpush3.msra.mxu1 %v692_v40 }
 0x2c6   : > { %1625 = vmatprep.subr.mxu1 %v1617_v37 }
 0x2c7   : > { %1626 = vmatpush3.msra.mxu1 %v1617_v37 }
 0x2c8   : > { %1627 = vmatprep.subr.mxu1 %v682_v38 }
 0x2c9   : > { %1628 = vmatpush3.msra.mxu1 %v682_v38 }
 0x2ca   : > { %1629 = vmatprep.subr.mxu1 %v1614_v35 }
 0x2cb   : > { %1630 = vmatpush3.msra.mxu1 %v1614_v35 }
 0x2cc   : > { %1631 = vmatprep.subr.mxu1 %v672_v36 }
 0x2cd   : > { %1632 = vmatpush3.msra.mxu1 %v672_v36 }
 0x2ce   : > { %1633 = vmatprep.subr.mxu1 %v1611_v33 }
 0x2cf   : > { %1634 = vmatpush3.msra.mxu1 %v1611_v33 }
 0x2d0   : > { %1635 = vmatprep.subr.mxu1 %v662_v34 }
 0x2d1   : > { %1636 = vmatpush3.msra.mxu1 %v662_v34 }
 0x2d2   : > { %1638 = vmatmul.mubr.msk.f32.vlgmr.msra.gmra.mxu1 %vm429_vm1, %v2143_v24  ;;  %1669 = vmatprep.subr.mxu1 %v841_v41  ;;  %v838_v24 = vld [vmem:[#allocation5] sm:$0xff] }
 0x2d3   : > { %1640 = vmatprep.mubr.msk.f32.mxu1 %vm429_vm1, %v2147_v25  ;;  %1670 = vmatpush3.msra.mxu1 %v841_v41 }
 0x2d4   : > { %1671 = vmatprep.subr.mxu1 %v840_v42 }
 0x2d5   : > { %1672 = vmatpush3.msra.mxu1 %v840_v42 }
 0x2d6   : > { %1641 = vmatmul.mubr.msk.f32.gmra.mxu1 %vm429_vm1, %v2155_v26  ;;  %1673 = vmatprep.subr.mxu1 %v839_v43 }
 0x2d7   : > { %1643 = vmatprep.mubr.msk.f32.mxu1 %vm429_vm1, %v2158_v27  ;;  %1674 = vmatpush3.msra.mxu1 %v839_v43 }
 0x2d8   : > { %1675 = vmatprep.subr.mxu1 %v838_v24 }
 0x2d9   : > { %1676 = vmatpush3.msra.mxu1 %v838_v24 }
 0x2da   : > { %1644 = vmatmul.mubr.msk.f32.gmra.mxu1 %vm429_vm1, %v2165_v28 }
 0x2db   : > { %1646 = vmatprep.mubr.msk.f32.mxu1 %vm429_vm1, %v2168_v29 }
 0x2de   : > { %1647 = vmatmul.mubr.msk.f32.gmra.mxu1 %vm429_vm1, %v2175_v30 }
 0x327   : > { %v1659_v54 = vpop.f32.mrf.mxu0 }
 0x329   : > { %v945_v55 = vpop.f32.mrf.mxu0 }
 0x32b   : > { %v1662_v56 = vpop.f32.mrf.mxu0 }
 0x32d   : > { %v955_v57 = vpop.f32.mrf.mxu0 }
 0x32f   : > { %v1665_v58 = vpop.f32.mrf.mxu0 }
 0x331   : > { %v965_v59 = vpop.f32.mrf.mxu0 }
 0x333   : > { %v1668_v60 = vpop.f32.mrf.mxu0 }
 0x335   : > { %v975_v61 = vpop.f32.mrf.mxu0 }
 0x337   : > { %v1699_v62 = vpop.f32.mrf.mxu0 }
 0x339   : > { %v1224_v63 = vpop.f32.mrf.mxu0 }
 0x33b   : > { %v1702_v0 = vpop.f32.mrf.mxu0 }
 0x33d   : > { %v1234_v1 = vpop.f32.mrf.mxu0 }
 0x33f   : > { %v1705_v7 = vpop.f32.mrf.mxu0 }
 0x341   : > { %v1244_v17 = vpop.f32.mrf.mxu0 }
 0x343   : > { %v1708_v33 = vpop.f32.mrf.mxu0 }
 0x345   : > { %v1254_v42 = vpop.f32.mrf.mxu0 }
 0x392   : > { %v1639_v25 = vpop.f32.mrf.mxu1 }
 0x393   : > { %v807_v45 = vmax.f32 %v1639_v25, 0.0 }
 0x394   : > { %v767_v44 = vpop.f32.mrf.mxu1 }
 0x395   : > { %v806_v26 = vmax.f32 %v767_v44, 0.0 }
 0x396   : > { %v1642_v46 = vpop.f32.mrf.mxu1 }
 0x397   : > { %1677 = vmatprep.mubr.msk.f32.mxu1 %vm571_vm2, %v806_v26  ;;  %v809_v47 = vmax.f32 %v1642_v46, 0.0 }
 0x398   : > { %v777_v27 = vpop.f32.mrf.mxu1  ;;  %1678 = vmatmul.mubr.msk.f32.vlgmr.msra.gmra.mxu1 %vm571_vm2, %v807_v45 }
 0x399   : > { %v808_v28 = vmax.f32 %v777_v27, 0.0 }
 0x39a   : > { %v1645_v48 = vpop.f32.mrf.mxu1 }
 0x39b   : > { %1680 = vmatprep.mubr.msk.f32.mxu1 %vm571_vm2, %v808_v28  ;;  %v811_v49 = vmax.f32 %v1645_v48, 0.0 }
 0x39c   : > { %v787_v29 = vpop.f32.mrf.mxu1  ;;  %1681 = vmatmul.mubr.msk.f32.gmra.mxu1 %vm571_vm2, %v809_v47 }
 0x39d   : > { %v810_v30 = vmax.f32 %v787_v29, 0.0 }
 0x39e   : > { %v1648_v50 = vpop.f32.mrf.mxu1 }
 0x39f   : > { %1683 = vmatprep.mubr.msk.f32.mxu1 %vm571_vm2, %v810_v30  ;;  %v813_v53 = vmax.f32 %v1648_v50, 0.0 }
 0x3a0   : > { %v797_v51 = vpop.f32.mrf.mxu1  ;;  %1684 = vmatmul.mubr.msk.f32.gmra.mxu1 %vm571_vm2, %v811_v49 }
 0x3a1   : > { %v812_v52 = vmax.f32 %v797_v51, 0.0 }
 0x3a3   : > { %1686 = vmatprep.mubr.msk.f32.mxu1 %vm571_vm2, %v812_v52 }
 0x3a4   : > { %1687 = vmatmul.mubr.msk.f32.gmra.mxu1 %vm571_vm2, %v813_v53 }
 0x458   : > { %v1679_v2 = vpop.f32.mrf.mxu1 }
 0x459   : > { %v1080_v3 = vadd.f32 %v1679_v2, %v1659_v54 }
 0x45a   : > { %v1074_v4 = vpop.f32.mrf.mxu1 }
 0x45b   : > { %v1264_v5 = vadd.f32 %v1699_v62, %v1080_v3  ;;  %v1075_v6 = vadd.f32 %v1074_v4, %v945_v55 }
 0x45c   : > { %v1682_v8 = vpop.f32.mrf.mxu1 }
 0x45d   : > { %v1276_v9 = vadd.f32 %v2096_v10, %v1264_v5  ;;  %v1263_v11 = vadd.f32 %v1224_v63, %v1075_v6  ;;  %v1090_v12 = vadd.f32 %v1682_v8, %v1662_v56 }
 0x45e   : > { %v1084_v13 = vpop.f32.mrf.mxu1 }
 0x45f   : > { %1284 = vst [vmem:[%s2256_s27 + $0x8] sm:$0xff] %v1276_v9  ;;  %v1275_v14 = vadd.f32 %v2096_v10, %v1263_v11  ;;  %v1266_v15 = vadd.f32 %v1702_v0, %v1090_v12  ;;  %v1085_v16 = vadd.f32 %v1084_v13, %v955_v57 }
 0x460   : > { %v1685_v18 = vpop.f32.mrf.mxu1 }
 0x461   : > { %1283 = vst [vmem:[%s2256_s27] sm:$0xff] %v1275_v14  ;;  %v1278_v19 = vadd.f32 %v2096_v10, %v1266_v15  ;;  %v1265_v20 = vadd.f32 %v1234_v1, %v1085_v16  ;;  %v1100_v21 = vadd.f32 %v1685_v18, %v1665_v58 }
 0x462   : > { %v1094_v22 = vpop.f32.mrf.mxu1 }
 0x463   : > { %1286 = vst [vmem:[%s2256_s27 + $0x18] sm:$0xff] %v1278_v19  ;;  %v1277_v23 = vadd.f32 %v2096_v10, %v1265_v20  ;;  %v1268_v31 = vadd.f32 %v1705_v7, %v1100_v21  ;;  %v1095_v32 = vadd.f32 %v1094_v22, %v965_v59 }
 0x464   : > { %v1688_v34 = vpop.f32.mrf.mxu1 }
 0x465   : > { %1285 = vst [vmem:[%s2256_s27 + $0x10] sm:$0xff] %v1277_v23  ;;  %v1280_v35 = vadd.f32 %v2096_v10, %v1268_v31  ;;  %v1267_v36 = vadd.f32 %v1244_v17, %v1095_v32  ;;  %v1110_v37 = vadd.f32 %v1688_v34, %v1668_v60 }
 0x466   : > { %v1104_v38 = vpop.f32.mrf.mxu1 }
 0x467   : > { %1288 = vst [vmem:[%s2256_s27 + $0x28] sm:$0xff] %v1280_v35  ;;  %v1279_v39 = vadd.f32 %v2096_v10, %v1267_v36  ;;  %v1270_v40 = vadd.f32 %v1708_v33, %v1110_v37  ;;  %v1105_v41 = vadd.f32 %v1104_v38, %v975_v61 }
 0x469   : > { %1287 = vst [vmem:[%s2256_s27 + $0x20] sm:$0xff] %v1279_v39  ;;  %v1282_v43 = vadd.f32 %v2096_v10, %v1270_v40  ;;  %v1269_v24 = vadd.f32 %v1254_v42, %v1105_v41 }
 0x46b   : > { %1290 = vst [vmem:[%s2256_s27 + $0x38] sm:$0xff] %v1282_v43  ;;  %v1281_v25 = vadd.f32 %v2096_v10, %v1269_v24 }
 0x46d   : > { %1289 = vst [vmem:[%s2256_s27 + $0x30] sm:$0xff] %v1281_v25 }
 0x46e   : > { %1844 = shalt.err (!%p1841_p5)
}
 0x46f   : > { %s1845_s15 = scalar_lea.hbm %s2275_s30, 1024  ;;  %s1849_s11 = scalar_lea.hbm %s2329_s6, 2048 }
 0x470   : > { %p1846_p2 = scmp.ne.s32.totalorder %s2275_s30, %s1845_s15  ;;  %p1850_p6 = scmp.lt.s32.totalorder %s2275_s30, %s2329_s6 }
 0x471   : > { %p1851_p8 = scmp.lt.s32.totalorder %s1849_s11, %s1845_s15 }
 0x472   : > { %p1847_p1 = pnand %p1846_p2, %p2349_p7 }
 0x473   : > { %p1852_p3 = por %p1851_p8, %p1850_p6 }
 0x474   : > { %p1848_p4 = pneg %p1847_p1 }
 0x476   : > { %p1853_p11 = pnand %p1852_p3, %p1848_p4 }
 0x478   : > { %1856 = shalt.err (!%p1853_p11)
}
 0x479   : > { %s1908_s20 = smov 128   ;;  %s1909_s16 = smov 8  }
 0x47a   : > { %1715 = dma.vmem_to_hbm [thread:$0]  (%p2349_p7), %s2277_s19, 1024, %s2275_s30, %s1292_s25, %s1908_s20, %s1908_s20, %s1909_s16  }
 0x47b PF: > { %s1320_s26 = sand.u32 1, %s1887_s21   ;;  %p2350_p9 = scmp.ne.s32.totalorder %s2337_s28, 0 }
 0x47c   : > { %p2351_p10 = scmp.ge.s32.totalorder %s1899_s24, 2  ;;  %s1321_s29 = scalar_lea.sflag [#allocation4], %s1320_s26 }
 0x47e   : > { %p1726_p12 = pnand %p2351_p10, %p2350_p9 }
 0x480   : > { %p1727_p13 = pneg %p1726_p12 }
 0x482   : > { %1882 = dma.done.wait (%p1727_p13), %s1321_s29, 1024  }
 0x483   : > { %1884 = vsyncadd (%p1727_p13), %s1321_s29, 4294966272  ;;  %p20_p0 = scmp.ge.s32.totalorder %s1999_s9, 4   ;;  %s2352_s21 = smov %s1891_s22 }
 0x484   : > { %s2353_s22 = smov %s1895_s23  ;;  %s2354_s23 = smov %s2019_s17 }
 0x485   : > { %s2355_s24 = smov %s1999_s9  ;;  %22 = sbr.rel (!%p20_p0) target bundleno = 6 (0x6), region = 98 }
 0x48a   :  { %1326 = vsyncpa [#allocation3], 1 }
 0x48b   :  { %1328 = vsyncpa [#allocation3 + $0x1], 1 }
 0x48c   :  { %1329 = vsyncpa [#allocation6], 1 }
 0x48d   :  { %1330 = vsyncpa [#allocation4], 1 }
 0x48e   :  { %1332 = vsyncpa [#allocation4 + $0x1], 1 }

</bundles_post_ra>
